<compile_context>
chip_gen: v7x
topology: tpu7x:2x2x1
jax: 0.10.0
libtpu: 0.0.40
codegen_flags: <defaults>
</compile_context>

<pallas_src>
import jax
import jax.numpy as jnp
from jax.experimental import pallas as pl
from jax.experimental.pallas import tpu as pltpu

EPS = 1e-5


def _pick_row_tile(n_rows, d, itemsize, target_bytes, min_steps):
    """Row tile ~target_bytes per grid step, sublane-aligned (mult of 8),
    capped so the grid keeps >= min_steps steps when there is enough work."""
    tr = max(1, target_bytes // max(1, d * itemsize))
    if min_steps > 1:
        tr = min(tr, pl.cdiv(n_rows, min_steps))
    if tr >= n_rows:
        return n_rows                      # single full-extent block
    tr = max(8, (tr // 8) * 8)             # sublane-aligned
    return n_rows if tr >= n_rows else tr


# --------------------------- standalone LayerNorm ---------------------------
def _layernorm_kernel(x_ref, g_ref, b_ref, o_ref):
    x = x_ref[...].astype(jnp.float32)                     # [TR, D]
    mu = jnp.mean(x, axis=-1, keepdims=True)               # [TR, 1]
    xc = x - mu                                            # centered (tile already in VMEM)
    var = jnp.mean(xc * xc, axis=-1, keepdims=True)
    inv = jax.lax.rsqrt(var + EPS)
    y = xc * inv * g_ref[...].astype(jnp.float32) + b_ref[...].astype(jnp.float32)
    o_ref[...] = y.astype(o_ref.dtype)


def layernorm_pallas(x, gamma, beta, *, block_rows=None,
                     target_block_bytes=2 * 1024 * 1024, min_grid_steps=8):
    """LayerNorm over the last dim (eps=1e-5), streaming over row bands."""
    orig_shape = x.shape
    D = orig_shape[-1]
    xf = x.reshape(-1, D)
    R = xf.shape[0]
    itemsize = jnp.dtype(x.dtype).itemsize

    if block_rows is None:
        tr = _pick_row_tile(R, D, itemsize, target_block_bytes, min_grid_steps)
    else:
        tr = min(block_rows, R)
        if tr < R:
            tr = max(8, (tr // 8) * 8)

    grid = (pl.cdiv(R, tr),)  # ragged last block -> masked output writes (no pad/slice)

    g2 = gamma.reshape(1, D)
    b2 = beta.reshape(1, D)

    # VMEM budget: double-buffered in/out tiles + f32 working copies + margin.
    tile_bytes = tr * D * itemsize
    vmem_needed = 4 * tile_bytes + 3 * (tr * D * 4) + (2 << 20)
    vmem_limit = int(min(max(vmem_needed, 32 << 20), 56 << 20))

    out = pl.pallas_call(
        _layernorm_kernel,
        out_shape=jax.ShapeDtypeStruct((R, D), x.dtype),
        grid_spec=pltpu.PrefetchScalarGridSpec(
            num_scalar_prefetch=0,
            grid=grid,
            in_specs=[
                pl.BlockSpec((tr, D), lambda i: (i, 0)),   # activation row band
                pl.BlockSpec((1, D), lambda i: (0, 0)),    # gamma (resident)
                pl.BlockSpec((1, D), lambda i: (0, 0)),    # beta  (resident)
            ],
            out_specs=pl.BlockSpec((tr, D), lambda i: (i, 0)),
        ),
        compiler_params=pltpu.CompilerParams(
            dimension_semantics=("parallel",),             # v7x: shard rows over 2 TCs
            vmem_limit_bytes=vmem_limit,
        ),
    )(xf, g2, b2)
    return out.reshape(orig_shape)


# ---------------------- fused PreNorm + Linear consumer ----------------------
def _prenorm_linear_kernel(x_ref, g_ref, b_ref, w_ref, bias_ref, o_ref):
    x = x_ref[...].astype(jnp.float32)                     # [TM, D]
    mu = jnp.mean(x, axis=-1, keepdims=True)
    xc = x - mu
    var = jnp.mean(xc * xc, axis=-1, keepdims=True)
    inv = jax.lax.rsqrt(var + EPS)
    y = xc * inv * g_ref[...].astype(jnp.float32) + b_ref[...].astype(jnp.float32)
    acc = jnp.dot(y, w_ref[...].astype(jnp.float32),
                  preferred_element_type=jnp.float32)      # MXU, [TM, TN]
    o_ref[...] = (acc + bias_ref[...].astype(jnp.float32)).astype(o_ref.dtype)


def pre_norm_linear_pallas(x, gamma, beta, w, bias, *, block_rows=None,
                           target_block_bytes=2 * 1024 * 1024, min_grid_steps=8):
    """Fused PreNorm for a linear fn: (LayerNorm(x) @ w + bias) with no HBM
    round trip of the normalized activation."""
    orig_shape = x.shape
    D = orig_shape[-1]
    N = w.shape[-1]
    xf = x.reshape(-1, D)
    R = xf.shape[0]
    itemsize = jnp.dtype(x.dtype).itemsize

    if block_rows is None:
        tm = _pick_row_tile(R, D, itemsize, target_block_bytes, min_grid_steps)
    else:
        tm = min(block_rows, R)
        if tm < R:
            tm = max(8, (tm // 8) * 8)

    if N % 128 == 0:
        tn = min(N, 512)      # lane-dense unmasked stores
    else:
        tn = N                # keep D/N multiples of 128 in production shapes

    grid = (pl.cdiv(R, tm), pl.cdiv(N, tn))

    g2 = gamma.reshape(1, D)
    b2 = beta.reshape(1, D)
    bias2 = bias.reshape(1, N)

    w_itemsize = jnp.dtype(w.dtype).itemsize
    vmem_needed = (4 * tm * D * max(itemsize, 4)     # x tiles (db) + f32 copy
                   + 2 * D * tn * w_itemsize         # W tiles (db)
                   + 4 * tm * tn * 4                 # out tiles (db) + f32 acc
                   + (2 << 20))
    vmem_limit = int(min(max(vmem_needed, 32 << 20), 56 << 20))

    out = pl.pallas_call(
        _prenorm_linear_kernel,
        out_shape=jax.ShapeDtypeStruct((R, N), x.dtype),
        grid_spec=pltpu.PrefetchScalarGridSpec(
            num_scalar_prefetch=0,
            grid=grid,
            in_specs=[
                pl.BlockSpec((tm, D), lambda i, j: (i, 0)),   # activation row band
                pl.BlockSpec((1, D), lambda i, j: (0, 0)),    # gamma
                pl.BlockSpec((1, D), lambda i, j: (0, 0)),    # beta
                pl.BlockSpec((D, tn), lambda i, j: (0, j)),   # projection weight
                pl.BlockSpec((1, tn), lambda i, j: (0, j)),   # projection bias
            ],
            out_specs=pl.BlockSpec((tm, tn), lambda i, j: (i, j)),
        ),
        compiler_params=pltpu.CompilerParams(
            dimension_semantics=("parallel", "parallel"),
            vmem_limit_bytes=vmem_limit,
        ),
    )(xf, g2, b2, w, bias2)
    return out.reshape(orig_shape[:-1] + (N,))


def pre_norm(x, gamma, beta, fn, **kwargs):
    """PreNorm.forward: fn(LayerNorm(x), **kwargs)."""
    # TODO(synk): `fn` is an arbitrary wrapped nn.Module; when it is a simple
    # projection use pre_norm_linear_pallas (fully fused). Otherwise it is
    # applied here as a plain JAX callable on the fused-LayerNorm output.
    return fn(layernorm_pallas(x, gamma, beta), **kwargs)


# ---------------------- pure-JAX reference (for verification) ----------------------
def pre_norm_reference(x, gamma, beta, fn, **kwargs):
    xf = x.astype(jnp.float32)
    mu = xf.mean(axis=-1, keepdims=True)
    var = ((xf - mu) ** 2).mean(axis=-1, keepdims=True)
    y = (xf - mu) / jnp.sqrt(var + EPS) * gamma.reshape(1, 1, -1) + beta.reshape(1, 1, -1)
    return fn(y.astype(x.dtype), **kwargs)


if __name__ == "__main__":
    key = jax.random.PRNGKey(0)
    B, S, D = 2, 16, 128               # lane-dense feature dim (multiple of 128)
    k0, k1, k2, k3, k4 = jax.random.split(key, 5)

    x = jax.random.normal(k0, (B, S, D), jnp.float32)
    gamma = 1.0 + 0.1 * jax.random.normal(k1, (D,), jnp.float32)
    beta = 0.1 * jax.random.normal(k2, (D,), jnp.float32)

    # the wrapped fn: a linear projection standing in for the module PreNorm wraps
    W = 0.05 * jax.random.normal(k3, (D, D), jnp.float32)
    bias = 0.05 * jax.random.normal(k4, (D,), jnp.float32)
    fn = lambda y: jnp.dot(y, W) + bias

    ref = jax.block_until_ready(pre_norm_reference(x, gamma, beta, fn))

    # 1) fused PreNorm+Linear kernel (no HBM round trip of the normalized activation)
    out_fused = jax.block_until_ready(pre_norm_linear_pallas(x, gamma, beta, W, bias))
    assert out_fused.shape == (B, S, D)
    if not jnp.allclose(out_fused, ref, atol=2e-3, rtol=2e-3):
        raise AssertionError(
            "fused mismatch vs reference, max abs err="
            f"{float(jnp.max(jnp.abs(out_fused - ref)))}")

    # 2) generic path: standalone LayerNorm kernel + arbitrary fn
    out_generic = jax.block_until_ready(pre_norm(x, gamma, beta, fn))
    assert out_generic.shape == (B, S, D)
    if not jnp.allclose(out_generic, ref, atol=2e-3, rtol=2e-3):
        raise AssertionError(
            "generic mismatch vs reference, max abs err="
            f"{float(jnp.max(jnp.abs(out_generic - ref)))}")

    print("KERNEL_OK")
</pallas_src>

<mosaic_0001>
module attributes {stable_mosaic.version = 11 : i64} {
  func.func @_prenorm_linear_kernel(%arg0: i32, %arg1: i32, %arg2: memref<8x128xf32, #tpu.memory_space<vmem>>, %arg3: memref<1x128xf32, #tpu.memory_space<vmem>>, %arg4: memref<1x128xf32, #tpu.memory_space<vmem>>, %arg5: memref<128x128xf32, #tpu.memory_space<vmem>>, %arg6: memref<1x128xf32, #tpu.memory_space<vmem>>, %arg7: memref<8x128xf32, #tpu.memory_space<vmem>>) attributes {dimension_semantics = [#tpu.dimension_semantics<parallel>, #tpu.dimension_semantics<parallel>], iteration_bounds = array<i64: 4, 1>, scalar_prefetch = 0 : i64, scratch_operands = 0 : i64, tpu.core_type = #tpu.core_type<tc>, window_params = [{transform_indices = @transform_0, window_bounds = array<i64: 8, 128>}, {pipeline_mode = #tpu.pipeline_mode<synchronous>, transform_indices = @transform_1, window_bounds = array<i64: 1, 128>}, {pipeline_mode = #tpu.pipeline_mode<synchronous>, transform_indices = @transform_2, window_bounds = array<i64: 1, 128>}, {transform_indices = @transform_3, window_bounds = array<i64: 128, 128>}, {transform_indices = @transform_4, window_bounds = array<i64: 1, 128>}, {transform_indices = @transform_5, window_bounds = array<i64: 8, 128>}]} {
    %c0 = arith.constant 0 : index
    %c0_0 = arith.constant 0 : index
    %0 = vector.load %arg2[%c0, %c0_0] : memref<8x128xf32, #tpu.memory_space<vmem>>, vector<8x128xf32>
    %cst = arith.constant dense<0.000000e+00> : vector<8xf32>
    %1 = vector.multi_reduction <add>, %0, %cst [1] : vector<8x128xf32> to vector<8xf32>
    %2 = vector.shape_cast %1 : vector<8xf32> to vector<8x1xf32>
    %cst_1 = arith.constant 1.280000e+02 : f32
    %3 = vector.broadcast %cst_1 : f32 to vector<8x1xf32>
    %4 = arith.divf %2, %3 : vector<8x1xf32>
    %5 = vector.broadcast %4 : vector<8x1xf32> to vector<8x128xf32>
    %6 = arith.subf %0, %5 : vector<8x128xf32>
    %7 = arith.mulf %6, %6 : vector<8x128xf32>
    %cst_2 = arith.constant dense<0.000000e+00> : vector<8xf32>
    %8 = vector.multi_reduction <add>, %7, %cst_2 [1] : vector<8x128xf32> to vector<8xf32>
    %9 = vector.shape_cast %8 : vector<8xf32> to vector<8x1xf32>
    %cst_3 = arith.constant 1.280000e+02 : f32
    %10 = vector.broadcast %cst_3 : f32 to vector<8x1xf32>
    %11 = arith.divf %9, %10 : vector<8x1xf32>
    %cst_4 = arith.constant 9.99999974E-6 : f32
    %12 = vector.broadcast %cst_4 : f32 to vector<8x1xf32>
    %13 = arith.addf %11, %12 : vector<8x1xf32>
    %14 = math.rsqrt %13 : vector<8x1xf32>
    %15 = vector.broadcast %14 : vector<8x1xf32> to vector<8x128xf32>
    %16 = arith.mulf %6, %15 : vector<8x128xf32>
    %c0_5 = arith.constant 0 : index
    %c0_6 = arith.constant 0 : index
    %17 = vector.load %arg3[%c0_5, %c0_6] : memref<1x128xf32, #tpu.memory_space<vmem>>, vector<1x128xf32>
    %18 = vector.broadcast %17 : vector<1x128xf32> to vector<8x128xf32>
    %19 = arith.mulf %16, %18 : vector<8x128xf32>
    %c0_7 = arith.constant 0 : index
    %c0_8 = arith.constant 0 : index
    %20 = vector.load %arg4[%c0_7, %c0_8] : memref<1x128xf32, #tpu.memory_space<vmem>>, vector<1x128xf32>
    %21 = vector.broadcast %20 : vector<1x128xf32> to vector<8x128xf32>
    %22 = arith.addf %19, %21 : vector<8x128xf32>
    %c0_9 = arith.constant 0 : index
    %c0_10 = arith.constant 0 : index
    %23 = vector.load %arg5[%c0_9, %c0_10] : memref<128x128xf32, #tpu.memory_space<vmem>>, vector<128x128xf32>
    %cst_11 = arith.constant dense<0.000000e+00> : vector<8x128xf32>
    %24 = tpu.matmul %22, %23, %cst_11 {dimension_numbers = #tpu.dot_dimension_numbers<[1], [0], [0], [1], [0, 0, 1, 1], [], []>} : vector<8x128xf32>, vector<128x128xf32>, vector<8x128xf32> -> vector<8x128xf32>
    %c0_12 = arith.constant 0 : index
    %c0_13 = arith.constant 0 : index
    %25 = vector.load %arg6[%c0_12, %c0_13] : memref<1x128xf32, #tpu.memory_space<vmem>>, vector<1x128xf32>
    %26 = vector.broadcast %25 : vector<1x128xf32> to vector<8x128xf32>
    %27 = arith.addf %24, %26 : vector<8x128xf32>
    %c0_14 = arith.constant 0 : index
    %c0_15 = arith.constant 0 : index
    %28 = vector.load %arg7[%c0_14, %c0_15] : memref<8x128xf32, #tpu.memory_space<vmem>>, vector<8x128xf32>
    tpu.vector_store %arg7[%c0_14, %c0_15], %27 {strides = array<i32>} : memref<8x128xf32, #tpu.memory_space<vmem>>, vector<8x128xf32>,
    return
  }
  func.func @transform_0(%arg0: i32, %arg1: i32) -> (i32, i32) {
    %c0_i32 = arith.constant 0 : i32
    %c0_i32_0 = arith.constant 0 : i32
    return %arg0, %c0_i32 : i32, i32
  }
  func.func @transform_1(%arg0: i32, %arg1: i32) -> (i32, i32) {
    %c0_i32 = arith.constant 0 : i32
    %c0_i32_0 = arith.constant 0 : i32
    %c0_i32_1 = arith.constant 0 : i32
    return %c0_i32, %c0_i32_0 : i32, i32
  }
  func.func @transform_2(%arg0: i32, %arg1: i32) -> (i32, i32) {
    %c0_i32 = arith.constant 0 : i32
    %c0_i32_0 = arith.constant 0 : i32
    %c0_i32_1 = arith.constant 0 : i32
    return %c0_i32, %c0_i32_0 : i32, i32
  }
  func.func @transform_3(%arg0: i32, %arg1: i32) -> (i32, i32) {
    %c0_i32 = arith.constant 0 : i32
    %c0_i32_0 = arith.constant 0 : i32
    return %c0_i32, %arg1 : i32, i32
  }
  func.func @transform_4(%arg0: i32, %arg1: i32) -> (i32, i32) {
    %c0_i32 = arith.constant 0 : i32
    %c0_i32_0 = arith.constant 0 : i32
    return %c0_i32, %arg1 : i32, i32
  }
  func.func @transform_5(%arg0: i32, %arg1: i32) -> (i32, i32) {
    %c0_i32 = arith.constant 0 : i32
    return %arg0, %arg1 : i32, i32
  }
}

</mosaic_0001>

<bundles_post_ra>
// kernel: tpu_custom_call.1
= control target key start
LH: loop header
LB: loop body
LE: loop exit
PB: predicated region body
PF: predicated region fallthrough
CT: control target
= control target key end

     0   :  { %10 = vsyncpa [#allocation3], 0  ;;  %s1115_s0 = inlined_call_operand.hbm [shape: f32[32,128], index: 0, kind: input, shape index: {}]   ;;  %s1116_s1 = inlined_call_operand.vmem [shape: f32[1,128], index: 1, kind: input, shape index: {}]   ;;  %s1117_s2 = inlined_call_operand.vmem [shape: f32[1,128], index: 2, kind: input, shape index: {}]   ;;  %s1118_s3 = inlined_call_operand.hbm [shape: f32[128,128], index: 3, kind: input, shape index: {}]   ;;  %s1119_s4 = inlined_call_operand.vmem [shape: f32[1,128], index: 4, kind: input, shape index: {}]   ;;  %s1120_s5 = inlined_call_operand.hbm [shape: f32[32,128], index: 5, kind: output, shape index: {}]  }
   0x1   :  { %12 = vsyncpa [#allocation3 + $0x1], 0 }
   0x2   :  { %13 = vsyncpa [#allocation6], 0 }
   0x3   :  { %14 = vsyncpa [#allocation4], 0 }
   0x4   :  { %16 = vsyncpa [#allocation4 + $0x1], 0  ;;  %s890_s18 = smov 0   ;;  %s892_s19 = smov 0  }
   0x5   :  { %s894_s20 = smov 0   ;;  %s896_s21 = smov 0  }
   0x6   :  { %s898_s22 = smov 0   ;;  %s900_s23 = smov 0  }
   0x7 LB: > { %s531_s24 = sadd.s32 4294967295, %s850_s23   ;;  %s532_s25 = sadd.s32 4294967294, %s850_s23   ;;  %s850_s23 = sphi %s900_s23, %s22_s23   ;;  %s846_s22 = sphi %s898_s22, %s1143_s22   ;;  %s842_s21 = sphi %s896_s21, %s1142_s21   ;;  %s838_s20 = sphi %s894_s20, %s1141_s20   ;;  %s834_s19 = sphi %s892_s19, %s1140_s19   ;;  %s830_s18 = sphi %s890_s18, %s1139_s18  }
   0x8   : > { %p54_p0 = scmp.ne.s32.totalorder %s834_s19, %s830_s18  ;;  %p924_p1 = scmp.eq.s32.totalorder %s531_s24, 0 }
   0x9   : > { %p928_p2 = scmp.eq.s32.totalorder %s531_s24, 3  ;;  %p180_p3 = scmp.eq.s32.totalorder %s532_s25, 3 }
   0xa   : > { %s1125_s26 = scalar_select %p924_p1, 1, 0 }
   0xb   : > { %s1126_s27 = scalar_select %p928_p2, 1, 0 }
   0xc   : > { %p934_p4 = por %p924_p1, %p54_p0  ;;  %p533_p5 = scmp.ge.s32.totalorder %s850_s23, 1 }
   0xd   : > { %p939_p6 = por %p180_p3, %p54_p0  ;;  %p187_p7 = scmp.lt.s32.totalorder %s850_s23, 5 }
   0xe   : > { %s1127_s28 = scalar_select %p934_p4, 1, 0 }
   0xf   : > { %s1128_s29 = scalar_select %p939_p6, 1, 0 }
  0x10   : > { %p944_p8 = pnand %p533_p5, %p187_p7  ;;  %s852_s6 = smov [#allocation5]  }
  0x11   : > { %s207_s7 = sshll.u32 %s852_s6, 4  ;;  %s34_s9 = sadd.s32 1, %s846_s22  ;;  %s208_s7 = int_to_ptr.vmem [resolvable:$true] %s207_s7 }
  0x12   : > { %s1129_s30 = scalar_select %p944_p8, 1, 0 }
  0x13   : > { %p634_p9 = pneg %p944_p8  ;;  %s706_s12 = scalar_lea.hbm %s1118_s3, 2048 }
  0x14   : > { %p707_p11 = scmp.ne.s32.totalorder %s1118_s3, %s706_s12  ;;  %p713_p3 = scmp.lt.u32.totalorder %s706_s12, %s1118_s3 }
  0x15   : > { %p952_p10 = pnand %p634_p9, %p924_p1 }
  0x17   : > { %p708_p12 = pneg %p952_p10 }
  0x19   : > { %p709_p13 = pnand %p708_p12, %p707_p11 }
  0x1b   : > { %p710_p0 = pneg %p709_p13 }
  0x1d   : > { %p715_p5 = pnand %p713_p3, %p710_p0 }
  0x1f   : > { %718 = shalt.err (!%p715_p5)
}
  0x20   : > { %s719_s17 = scalar_lea.vmem %s208_s7, 2048  ;;  %p727_p1 = scmp.lt.s32.totalorder %s208_s7, %s208_s7 }
  0x21   : > { %p720_p7 = scmp.ne.s32.totalorder %s208_s7, %s719_s17  ;;  %p728_p4 = scmp.lt.s32.totalorder %s719_s17, %s719_s17 }
  0x23   : > { %p722_p9 = pnand %p720_p7, %p708_p12  ;;  %p729_p8 = por %p728_p4, %p727_p1 }
  0x25   : > { %p723_p6 = pneg %p722_p9 }
  0x27   : > { %p730_p2 = pnand %p729_p8, %p723_p6 }
  0x29   : > { %733 = shalt.err (!%p730_p2)
}
  0x2a   : > { %s853_s24 = smov 128   ;;  %s854_s25 = smov 8  }
  0x2b   : > { %637 = dma.hbm_to_vmem [thread:$0]  (!%p952_p10), %s1118_s3, 2048, %s208_s7, [#allocation6], %s853_s24, %s853_s24, %s854_s25  }
  0x2c   : > { %p36_p1 = scmp.ge.s32.totalorder %s34_s9, 4  ;;  %s41_s11 = sadd.s32 1, %s838_s20 }
  0x2d   : > { %p48_p2 = scmp.ne.s32.totalorder %s838_s20, %s834_s19  ;;  %p49_p4 = scmp.eq.s32.totalorder %s850_s23, 0 }
  0x2e   : > { %s1145_s9 = smov (%p36_p1, %s34_s9), 0  ;;  %p1132_p8 = scmp.ne.s32.totalorder %s1126_s27, 0 }
  0x2f   : > { %p979_p6 = por %p49_p4, %p48_p2  ;;  %s38_s8 = ssub.s32 %s846_s22, %s1145_s9 }
  0x30   : > { %p985_p11 = por %p1132_p8, %p48_p2  ;;  %p647_p12 = scmp.lt.s32.totalorder %s850_s23, 4 }
  0x31   : > { %p39_p10 = scmp.eq.s32.totalorder %s38_s8, 0  ;;  %s227_s7 = sand.u32 1, %s838_s20  }
  0x32   : > { %s537_s14 = sshll.u32 %s227_s7, 3  ;;  %s538_s16 = sshll.u32 %s846_s22, 7 }
  0x33   : > { %s994_s15 = scalar_select %p39_p10, %s838_s20, %s41_s11  }
  0x34   : > { %s1000_s25 = scalar_lea.hbm %s1115_s0, %s538_s16  ;;  %s231_s27 = scalar_lea.vmem [#allocation2], %s537_s14 }
  0x35   : > { %s238_s6 = sshll.u32 %s231_s27, 4  ;;  %p1006_p13 = pnand %p647_p12, %p979_p6  ;;  %s1002_s6 = int_to_ptr.vmem [resolvable:$true] %s238_s6 }
  0x36   : > { %s228_s11 = scalar_lea.sflag [#allocation3], %s227_s7  ;;  %s734_s8 = scalar_lea.hbm %s1000_s25, 128 }
  0x37   : > { %p735_p0 = scmp.ne.s32.totalorder %s1000_s25, %s734_s8  ;;  %p736_p3 = pneg %p1006_p13 }
  0x38   : > { %s739_s17 = scalar_lea.hbm %s1115_s0, 512  ;;  %p740_p9 = scmp.lt.u32.totalorder %s1000_s25, %s1115_s0 }
  0x39   : > { %p737_p5 = pnand %p736_p3, %p735_p0  ;;  %p741_p1 = scmp.lt.u32.totalorder %s739_s17, %s734_s8 }
  0x3a   : > { %p743_p4 = scmp.lt.u32.totalorder %s734_s8, %s1000_s25 }
  0x3b   : > { %p738_p7 = pneg %p737_p5  ;;  %p742_p2 = por %p741_p1, %p740_p9 }
  0x3d   : > { %p744_p6 = por %p743_p4, %p742_p2 }
  0x3f   : > { %p745_p8 = pnand %p744_p6, %p738_p7 }
  0x41   : > { %748 = shalt.err (!%p745_p8)
}
  0x42   : > { %s749_s7 = scalar_lea.vmem %s1002_s6, 128  ;;  %s855_s27 = smov [#allocation2]  }
  0x43   : > { %p750_p12 = scmp.ne.s32.totalorder %s1002_s6, %s749_s7  ;;  %s754_s14 = sshll.u32 %s855_s27, 4  ;;  %s755_s14 = int_to_ptr.vmem [resolvable:$false] %s754_s14 }
  0x44   : > { %s756_s16 = scalar_lea.vmem %s755_s14, 256  ;;  %p757_p5 = scmp.lt.s32.totalorder %s1002_s6, %s755_s14 }
  0x45   : > { %p752_p10 = pnand %p750_p12, %p736_p3  ;;  %p758_p9 = scmp.lt.s32.totalorder %s756_s16, %s749_s7 }
  0x47   : > { %p753_p0 = pneg %p752_p10  ;;  %p759_p1 = por %p758_p9, %p757_p5 }
  0x49   : > { %p760_p2 = pnand %p759_p1, %p753_p0 }
  0x4b   : > { %763 = shalt.err (!%p760_p2)
}
  0x4c   : > { %641 = dma.hbm_to_vmem [thread:$0]  (!%p1006_p13), %s1000_s25, 128, %s1002_s6, %s228_s11  }
  0x4d   : > { %p1135_p7 = scmp.ne.s32.totalorder %s1129_s30, 0 }
  0x4e   : > { %s1038_s8 = sand.u32 (!%p1135_p7), 1, %s834_s19   ;;  %p1136_p3 = scmp.ne.s32.totalorder (!%p1135_p7), %s1127_s28, 0 }
  0x4f   : > { %247 = sbr.rel (%p1135_p7) target bundleno = 630 (0x276), region = 40  ;;  %s540_s17 = sshll.u32 (!%p1135_p7), %s1038_s8, 3 }
  0x50   : > { %s250_s12 = scalar_lea.sflag (!%p1135_p7), [#allocation3], %s1038_s8  ;;  %s253_s24 = scalar_lea.vmem (!%p1135_p7), [#allocation2], %s540_s17 }
  0x56   : > { %817 = dma.done.wait (%p1136_p3), %s250_s12, 128  }
  0x57   : > { %819 = vsyncadd (%p1136_p3), %s250_s12, 4294967168  ;;  %p1137_p13 = scmp.ne.s32.totalorder %s1125_s26, 0 }
  0x59   : > { %821 = dma.done.wait (%p1137_p13), [#allocation6], 2048  }
  0x5a   : > { %823 = vsyncadd (%p1137_p13), [#allocation6], 4294965248  ;;  %v290_v0 = vld [vmem:[%s253_s24] sm:$0xff]  ;;  %v319_v1 = vld [vmem:[#allocation5] sm:$0xff]  ;;  %v856_v4 = vmov 0.0|0.0   ;;  %vm857_vm0 = vmmov 0  }
  0x5b   : > { %291 = vadd.xlane.f32.xlu0 %v290_v0  ;;  %v320_v2 = vld [vmem:[#allocation5 + $0x8] sm:$0xff]  ;;  %v321_v3 = vld [vmem:[#allocation5 + $0x10] sm:$0xff]  ;;  %602 = vmatprep.subr.bf16.mxu0 %v856_v4  ;;  %v322_v6 = vld [vmem:[#allocation5 + $0x18] sm:$0xff]  ;;  %v858_v23 = vmov 0.0   ;;  %s547_s11 = sshll.u32 %s842_s21, 7  ;;  %s286_s7 = scalar_lea.vmem [#allocation7], %s540_s17 }
  0x5c   : > { %v603_v5 = vpack.c.bf16 %v320_v2, %v319_v1  ;;  %v606_v7 = vpack.c.bf16 %v322_v6, %v321_v3  ;;  %v323_v8 = vld [vmem:[#allocation5 + $0x20] sm:$0xff]  ;;  %v324_v9 = vld [vmem:[#allocation5 + $0x28] sm:$0xff]  ;;  %v325_v15 = vld [vmem:[#allocation5 + $0x30] sm:$0xff]  ;;  %599 = vmatprep.mubr.msk.f32.mxu0 %vm857_vm0, %v858_v23  ;;  %s428_s27 = sshll.u32 %s286_s7, 4  ;;  %s1067_s12 = scalar_lea.hbm %s1120_s5, %s547_s11  ;;  %s1069_s27 = int_to_ptr.vmem [resolvable:$true] %s428_s27 }
  0x5d   : > { %v609_v10 = vpack.c.bf16 %v324_v9, %v323_v8  ;;  %v326_v16 = vld [vmem:[#allocation5 + $0x38] sm:$0xff]  ;;  %v327_v18 = vld [vmem:[#allocation5 + $0x40] sm:$0xff]  ;;  %v328_v19 = vld [vmem:[#allocation5 + $0x48] sm:$0xff]  ;;  %s414_s24 = scalar_lea.sflag [#allocation4], %s1038_s8  ;;  %s764_s26 = scalar_lea.vmem %s1069_s27, 128 }
  0x5e   : > { %604 = vmatpush3.bf16.msra.mxu0 %v603_v5  ;;  %v612_v17 = vpack.c.bf16 %v326_v16, %v325_v15  ;;  %v615_v20 = vpack.c.bf16 %v328_v19, %v327_v18  ;;  %v329_v21 = vld [vmem:[#allocation5 + $0x50] sm:$0xff]  ;;  %v330_v22 = vld [vmem:[#allocation5 + $0x58] sm:$0xff]  ;;  %v331_v25 = vld [vmem:[#allocation5 + $0x60] sm:$0xff]  ;;  %p765_p4 = scmp.ne.s32.totalorder %s1069_s27, %s764_s26  ;;  %s859_s21 = smov [#allocation7]  }
  0x5f   : > { %605 = vmatprep.subr.bf16.mxu0 %v856_v4  ;;  %v618_v24 = vpack.c.bf16 %v330_v22, %v329_v21  ;;  %v332_v26 = vld [vmem:[#allocation5 + $0x68] sm:$0xff]  ;;  %v333_v28 = vld [vmem:[#allocation5 + $0x70] sm:$0xff]  ;;  %v334_v29 = vld [vmem:[#allocation5 + $0x78] sm:$0xff]  ;;  %s768_s17 = sshll.u32 %s859_s21, 4  ;;  %s769_s17 = int_to_ptr.vmem [resolvable:$false] %s768_s17 }
  0x60   : > { %v621_v27 = vpack.c.bf16 %v332_v26, %v331_v25  ;;  %v624_v30 = vpack.c.bf16 %v334_v29, %v333_v28  ;;  %v543_v35 = vld [vmem:[%s1116_s1] ss:$0 sm:$0xff]  ;;  %p766_p6 = pnand %p765_p4, %p985_p11  ;;  %s770_s28 = scalar_lea.vmem %s769_s17, 256 }
  0x61   : > { %v544_v37 = vld [vmem:[%s1117_s2] ss:$0 sm:$0xff]  ;;  %p771_p12 = scmp.lt.s32.totalorder %s1069_s27, %s769_s17  ;;  %p772_p10 = scmp.lt.s32.totalorder %s770_s28, %s764_s26 }
  0x62   : > { %607 = vmatpush3.bf16.msra.mxu0 %v606_v7  ;;  %v545_v40 = vld [vmem:[%s1119_s4] ss:$0 sm:$0xff]  ;;  %p767_p8 = pneg %p766_p6 }
  0x63   : > { %608 = vmatprep.subr.bf16.mxu0 %v856_v4  ;;  %p773_p0 = por %p772_p10, %p771_p12 }
  0x65   : > { %p774_p5 = pnand %p773_p0, %p767_p8 }
  0x66   : > { %610 = vmatpush3.bf16.msra.mxu0 %v609_v10 }
  0x67   : > { %611 = vmatprep.subr.bf16.mxu0 %v856_v4 }
  0x6a   : > { %613 = vmatpush3.bf16.msra.mxu0 %v612_v17 }
  0x6b   : > { %614 = vmatprep.subr.bf16.mxu0 %v856_v4 }
  0x6e   : > { %616 = vmatpush3.bf16.msra.mxu0 %v615_v20 }
  0x6f   : > { %617 = vmatprep.subr.bf16.mxu0 %v856_v4 }
  0x72   : > { %619 = vmatpush3.bf16.msra.mxu0 %v618_v24 }
  0x73   : > { %620 = vmatprep.subr.bf16.mxu0 %v856_v4 }
  0x76   : > { %622 = vmatpush3.bf16.msra.mxu0 %v621_v27 }
  0x77   : > { %623 = vmatprep.subr.bf16.mxu0 %v856_v4 }
  0x7a   : > { %625 = vmatpush3.bf16.msra.mxu0 %v624_v30 }
  0xe8   : > { %v292_v11 = vpop.xlane.xlu0 %291 }
  0xe9   : > { %v294_v12 = vmul.f32 0.0078125, %v292_v11 }
  0xeb   : > { %v295_v13 = vsub.f32 %v290_v0, %v294_v12 }
  0xed   : > { %v296_v14 = vmul.f32 %v295_v13, %v295_v13 }
  0xef   : > { %297 = vadd.xlane.f32.xlu0 %v296_v14 }
 0x17c   : > { %v298_v31 = vpop.xlane.xlu0 %297 }
 0x17d   : > { %v299_v32 = vmul.f32 0.0078125, %v298_v31 }
 0x17f   : > { %v300_v33 = vadd.f32 1e-05, %v299_v32 }
 0x181   : > { %704 = vrsqrt.f32 %v300_v33 }
 0x18b   : > { %v705_v34 = vpop.eup %704 }
 0x18c   : > { %v302_v36 = vmul.f32 %v705_v34, %v295_v13 }
 0x18e   : > { %v310_v38 = vmul.f32 %v543_v35, %v302_v36 }
 0x190   : > { %v318_v39 = vadd.f32 %v544_v37, %v310_v38 }
 0x192   : > { %600 = vmatmul.mubr.f32.vlgmr.msra.gmra.mrb[0].mxu0 %v318_v39 }
 0x265   : > { %v408_v41 = vpop.f32.mrb[0].mxu0 }
 0x266   : > { %v409_v42 = vadd.f32 %v545_v40, %v408_v41  ;;  %v601_v43 = vpop.f32.mrb[1].mxu0 }
 0x268   : > { %412 = vst [vmem:[%s286_s7] sm:$0xff] %v409_v42 }
 0x269   : > { %777 = shalt.err (!%p774_p5)
}
 0x26a   : > { %s778_s8 = scalar_lea.hbm %s1067_s12, 128  ;;  %s782_s6 = scalar_lea.hbm %s1120_s5, 512 }
 0x26b   : > { %p779_p9 = scmp.ne.s32.totalorder %s1067_s12, %s778_s8  ;;  %p783_p7 = scmp.lt.u32.totalorder %s1067_s12, %s1120_s5 }
 0x26c   : > { %p784_p3 = scmp.lt.u32.totalorder %s782_s6, %s778_s8  ;;  %p786_p4 = scmp.lt.u32.totalorder %s778_s8, %s1067_s12 }
 0x26d   : > { %p780_p1 = pnand %p779_p9, %p985_p11 }
 0x26e   : > { %p785_p13 = por %p784_p3, %p783_p7 }
 0x26f   : > { %p781_p2 = pneg %p780_p1 }
 0x270   : > { %p787_p6 = por %p786_p4, %p785_p13 }
 0x272   : > { %p788_p8 = pnand %p787_p6, %p781_p2 }
 0x274   : > { %791 = shalt.err (!%p788_p8)
}
 0x275   : > { %632 = dma.vmem_to_hbm [thread:$0]  (%p985_p11), %s1069_s27, 128, %s1067_s12, %s414_s24  }
 0x276 PF: > { %p649_p12 = scmp.ge.s32.totalorder %s850_s23, 2  ;;  %s440_s7 = sand.u32 1, %s830_s18  }
 0x277   : > { %p1138_p10 = scmp.ne.s32.totalorder %s1128_s29, 0  ;;  %s441_s14 = scalar_lea.sflag [#allocation4], %s440_s7 }
 0x279   : > { %p643_p0 = pnand %p649_p12, %p1138_p10 }
 0x27b   : > { %825 = dma.done.wait (!%p643_p0), %s441_s14, 128  }
 0x27c   : > { %827 = vsyncadd (!%p643_p0), %s441_s14, 4294967168  ;;  %s22_s23 = sadd.s32 1, %s850_s23   ;;  %s1139_s18 = smov %s834_s19 }
 0x27d   : > { %p19_p5 = scmp.ge.s32.totalorder %s22_s23, 6   ;;  %s1140_s19 = smov %s838_s20 }
 0x27e   : > { %s1141_s20 = smov %s994_s15  ;;  %s1142_s21 = smov %s846_s22 }
 0x27f   : > { %s1143_s22 = smov %s1145_s9  ;;  %21 = sbr.rel (!%p19_p5) target bundleno = 7 (0x7), region = 93 }
 0x286   :  { %446 = vsyncpa [#allocation3], 1 }
 0x287   :  { %448 = vsyncpa [#allocation3 + $0x1], 1 }
 0x288   :  { %449 = vsyncpa [#allocation6], 1 }
 0x289   :  { %450 = vsyncpa [#allocation4], 1 }
 0x28a   :  { %452 = vsyncpa [#allocation4 + $0x1], 1 }

</bundles_post_ra>
